<compile_context>
chip_gen: v5e
topology: v5e:2x2
jax: 0.10.0
libtpu: 0.0.40
codegen_flags: <defaults>
</compile_context>

<pallas_src>
from functools import partial

import jax
import jax.numpy as jnp
from jax.experimental import pallas as pl
from jax.experimental.pallas import tpu as pltpu


_CIN_PAD = 8                        # input channels padded to one sublane tile
_K_AUG = 9 * _CIN_PAD + _CIN_PAD    # 9 taps * 8 rows + 8-row bias block = 80


# --------------------------------------------------------------------------------------
# Kernel 1: 3x3 conv + bias + ReLU, channel-major, flat H*W on lanes.
# --------------------------------------------------------------------------------------
def conv3x3_relu_kernel(x_ref, w_ref, o_ref, xpad_ref, patch_ref, *, width, halo):
    # x_ref    : (1, Cin, HW)        one image, channels on sublanes, flat H*W on lanes
    # w_ref    : (Cout, 80)          im2col weights, bias folded into column 72
    # o_ref    : (1, Cout, HW)       lane-dense output
    # xpad_ref : VMEM (8, HW+2*halo) flat zero-padded image (Cin padded to 8 rows)
    # patch_ref: VMEM (80, HW)       im2col patch matrix
    Cin = x_ref.shape[1]
    HW = x_ref.shape[2]
    W = width

    # Stage the image into the flat, zero-padded scratch (lane offset `halo` is a
    # multiple of 128, sublane offset 0 -> fully aligned store).
    xpad_ref[...] = jnp.zeros_like(xpad_ref)
    xpad_ref[0:Cin, halo:halo + HW] = x_ref[0].astype(jnp.float32)

    # Lane-position helper: w-coordinate of every flattened pixel, used to mask the
    # horizontal wrap of the flat shift at the left/right image borders.  Computed once.
    pos = jax.lax.broadcasted_iota(jnp.int32, (_CIN_PAD, HW), 1)
    if (W & (W - 1)) == 0:                       # power-of-two width -> cheap bit mask
        col = jnp.bitwise_and(pos, W - 1)
    else:
        col = pos % W
    mask_left = col >= 1                         # valid lanes for dw == -1 taps
    mask_right = col <= W - 2                    # valid lanes for dw == +1 taps

    # im2col: 9 shifted copies of the flat image (one per 3x3 tap), each 8 rows.
    # Vertical out-of-range taps read the zero halo; horizontal wrap is masked.
    for t, (kh, kw) in enumerate((kh, kw) for kh in range(3) for kw in range(3)):
        dh, dw = kh - 1, kw - 1
        start = halo + dh * W + dw               # static lane offset into the scratch
        tap = xpad_ref[:, start:start + HW]      # (8, HW)
        if dw == -1:
            tap = jnp.where(mask_left, tap, 0.0)
        elif dw == 1:
            tap = jnp.where(mask_right, tap, 0.0)
        patch_ref[t * _CIN_PAD:(t + 1) * _CIN_PAD, :] = tap

    # Bias block: patch rows 72..79, with row 72 == 1.0 (bias lives in w_ref[:, 72]).
    row = jax.lax.broadcasted_iota(jnp.int32, (_CIN_PAD, HW), 0)
    patch_ref[9 * _CIN_PAD:, :] = (row == 0).astype(jnp.float32)

    # Single MXU matmul over K=80, lane-dense N=HW; f32 accumulate, ReLU epilogue.
    acc = jnp.dot(w_ref[...], patch_ref[...], preferred_element_type=jnp.float32)
    o_ref[0] = jnp.maximum(acc, 0.0).astype(o_ref.dtype)


def _build_conv_weights(w_hwio, b):
    """(3,3,Cin,Cout) HWIO weights + (Cout,) bias -> (Cout, 80) im2col weight matrix."""
    Cin, Cout = w_hwio.shape[2], w_hwio.shape[3]
    w9 = w_hwio.reshape(9, Cin, Cout)
    w9 = jnp.pad(w9, ((0, 0), (0, _CIN_PAD - Cin), (0, 0)))       # (9, 8, Cout)
    bias_blk = jnp.pad(b[None, :], ((0, _CIN_PAD - 1), (0, 0)))   # (8, Cout), row 0 = bias
    wk = jnp.concatenate([w9.reshape(9 * _CIN_PAD, Cout), bias_blk], axis=0)  # (80, Cout)
    return jnp.transpose(wk)                                      # (Cout, 80)


def conv3x3_relu_nchw(x_nchw, w_hwio, b):
    N, Cin, H, W = x_nchw.shape
    Cout = w_hwio.shape[-1]
    HW = H * W
    if Cin > _CIN_PAD:
        raise ValueError(f"Cin={Cin} > {_CIN_PAD} not supported by this stem kernel")

    halo = -(-(W + 1) // 128) * 128              # 128-aligned flat halo, >= W+1
    w_aug = _build_conv_weights(w_hwio, b)       # tiny, wrapper-side
    x_flat = x_nchw.reshape(N, Cin, HW)          # free reshape, stays channel-major

    out_flat = pl.pallas_call(
        partial(conv3x3_relu_kernel, width=W, halo=halo),
        out_shape=jax.ShapeDtypeStruct((N, Cout, HW), x_nchw.dtype),
        grid=(N,),
        in_specs=[
            pl.BlockSpec((1, Cin, HW), lambda n: (n, 0, 0)),
            pl.BlockSpec((Cout, _K_AUG), lambda n: (0, 0)),
        ],
        out_specs=pl.BlockSpec((1, Cout, HW), lambda n: (n, 0, 0)),
        scratch_shapes=[
            pltpu.VMEM((_CIN_PAD, HW + 2 * halo), jnp.float32),
            pltpu.VMEM((_K_AUG, HW), jnp.float32),
        ],
        compiler_params=pltpu.CompilerParams(
            dimension_semantics=("parallel",),
            vmem_limit_bytes=32 * 1024 * 1024,
        ),
    )(x_flat, w_aug)
    return out_flat.reshape(N, Cout, H, W)


# --------------------------------------------------------------------------------------
# Kernel 2: create_frustum_features
#   softmax over depth bins (D+1), drop last bin, broadcast-multiply with image features.
# --------------------------------------------------------------------------------------
def frustum_kernel(feat_ref, logit_ref, o_ref):
    # feat_ref : (1, C, T)      image features (flat spatial chunk on lanes)
    # logit_ref: (1, D+1, T)    depth logits
    # o_ref    : (1, C, D, T)   frustum features
    D = o_ref.shape[2]

    logits = logit_ref[0].astype(jnp.float32)             # (D+1, T)
    m = jnp.max(logits, axis=0, keepdims=True)            # (1, T)
    e = jnp.exp(logits - m)                               # (D+1, T)
    s = jnp.sum(e, axis=0, keepdims=True)                 # (1, T)
    inv = pl.reciprocal(s, approx=True)                   # EUP reciprocal (~1e-4 rel err)
    p = e[:D, :] * inv                                     # (D, T), last bin dropped

    # Single broadcast-multiply and one lane-dense store of the whole (C, D, T) block:
    # feat broadcast along the D (sublane) axis, probs replicated along C (outer axis).
    feat = feat_ref[0].astype(jnp.float32)                 # (C, T)
    o_ref[0] = (feat[:, None, :] * p[None, :, :]).astype(o_ref.dtype)


def _pick_hw_tile(hw, max_lanes=2048):
    """Largest lane-aligned chunk of the flattened spatial axis (<= max_lanes)."""
    if hw <= max_lanes:
        return hw
    for t in range(max_lanes, 0, -128):
        if hw % t == 0:
            return t
    return hw


def create_frustum_features(image_features, depth_logits):
    # image_features: (N, C, H, W)   depth_logits: (N, D+1, H, W)   (PyTorch NCHW layout)
    N, C, H, W = image_features.shape
    Dp1 = depth_logits.shape[1]
    D = Dp1 - 1
    HW = H * W
    T = _pick_hw_tile(HW)

    feat_flat = image_features.reshape(N, C, HW)     # free reshapes
    logit_flat = depth_logits.reshape(N, Dp1, HW)

    out_flat = pl.pallas_call(
        frustum_kernel,
        out_shape=jax.ShapeDtypeStruct((N, C, D, HW), image_features.dtype),
        grid=(N, HW // T),
        in_specs=[
            pl.BlockSpec((1, C, T), lambda n, s: (n, 0, s)),
            pl.BlockSpec((1, Dp1, T), lambda n, s: (n, 0, s)),
        ],
        out_specs=pl.BlockSpec((1, C, D, T), lambda n, s: (n, 0, 0, s)),
        compiler_params=pltpu.CompilerParams(
            dimension_semantics=("parallel", "parallel"),
            vmem_limit_bytes=32 * 1024 * 1024,
        ),
    )(feat_flat, logit_flat)
    return out_flat.reshape(N, C, D, H, W)


# --------------------------------------------------------------------------------------
# SegIFN module (JAX/Pallas version)
# --------------------------------------------------------------------------------------
class SegIFN:
    def __init__(self, key, in_channels=3, feat_channels=16):
        k1, k2 = jax.random.split(key)
        # Deterministic synthetic parameters (3x3 conv "layer1" stem).
        self.w = jax.random.normal(k1, (3, 3, in_channels, feat_channels), jnp.float32) * 0.1
        self.b = jax.random.normal(k2, (feat_channels,), jnp.float32) * 0.01

    def forward(self, batch_dict):
        images = batch_dict['images']                        # (N, 3, H, W), NCHW
        feats = conv3x3_relu_nchw(images, self.w, self.b)    # (N, C, H, W), stays NCHW
        batch_dict['image_features2d'] = feats
        return batch_dict

    def create_frustum_features(self, image_features, depth_logits):
        return create_frustum_features(image_features, depth_logits)


# --------------------------------------------------------------------------------------
if __name__ == "__main__":
    key = jax.random.PRNGKey(0)
    k_img, k_logit, k_param = jax.random.split(key, 3)

    N, Cin, H, W = 2, 3, 16, 16
    Cfeat, Dbins = 16, 8

    images = jax.random.normal(k_img, (N, Cin, H, W), jnp.float32)
    model = SegIFN(k_param, in_channels=Cin, feat_channels=Cfeat)

    # --- forward pass ---
    batch_dict = model.forward({'images': images})
    feats = jax.block_until_ready(batch_dict['image_features2d'])   # (N, Cfeat, H, W)

    # reference: 3x3 'SAME' conv + bias + ReLU in plain JAX (NCHW)
    ref = jax.lax.conv_general_dilated(
        images, model.w, window_strides=(1, 1), padding='SAME',
        dimension_numbers=('NCHW', 'HWIO', 'NCHW'))
    ref = jnp.maximum(ref + model.b[None, :, None, None], 0.0)
    assert feats.shape == (N, Cfeat, H, W)
    assert jnp.allclose(feats, ref, atol=1e-4, rtol=1e-4)

    # --- create_frustum_features ---
    depth_logits = jax.random.normal(k_logit, (N, Dbins + 1, H, W), jnp.float32)
    frustum = jax.block_until_ready(model.create_frustum_features(feats, depth_logits))
    probs_ref = jax.nn.softmax(depth_logits, axis=1)[:, :-1]             # (N, D, H, W)
    frustum_ref = probs_ref[:, None, :, :, :] * feats[:, :, None, :, :]   # (N, C, D, H, W)
    assert frustum.shape == (N, Cfeat, Dbins, H, W)
    # tolerance loosened vs exact softmax: the kernel uses the EUP approx reciprocal
    # (~1e-4 relative error).
    assert jnp.allclose(frustum, frustum_ref, atol=2e-3, rtol=2e-3)

    print("KERNEL_OK")
</pallas_src>

<mosaic_0001>
module attributes {stable_mosaic.version = 11 : i64} {
  func.func @conv3x3_relu_kernel(%arg0: i32, %arg1: memref<1x3x256xf32, #tpu.memory_space<vmem>>, %arg2: memref<16x80xf32, #tpu.memory_space<vmem>>, %arg3: memref<1x16x256xf32, #tpu.memory_space<vmem>>, %arg4: memref<8x512xf32, #tpu.memory_space<vmem>>, %arg5: memref<80x256xf32, #tpu.memory_space<vmem>>) attributes {dimension_semantics = [#tpu.dimension_semantics<parallel>], iteration_bounds = array<i64: 2>, scalar_prefetch = 0 : i64, scratch_operands = 2 : i64, tpu.core_type = #tpu.core_type<tc>, window_params = [{transform_indices = @transform_0, window_bounds = array<i64: 1, 3, 256>}, {pipeline_mode = #tpu.pipeline_mode<synchronous>, transform_indices = @transform_1, window_bounds = array<i64: 16, 80>}, {transform_indices = @transform_2, window_bounds = array<i64: 1, 16, 256>}]} {
    %cst = arith.constant 0.000000e+00 : f32
    %0 = vector.broadcast %cst : f32 to vector<8x512xf32>
    %c0 = arith.constant 0 : index
    %c0_0 = arith.constant 0 : index
    %1 = vector.load %arg4[%c0, %c0_0] : memref<8x512xf32, #tpu.memory_space<vmem>>, vector<8x512xf32>
    tpu.vector_store %arg4[%c0, %c0_0], %0 {strides = array<i32>} : memref<8x512xf32, #tpu.memory_space<vmem>>, vector<8x512xf32>,
    %c0_1 = arith.constant 0 : index
    %c0_2 = arith.constant 0 : index
    %c0_3 = arith.constant 0 : index
    %2 = vector.load %arg1[%c0_1, %c0_2, %c0_3] : memref<1x3x256xf32, #tpu.memory_space<vmem>>, vector<1x3x256xf32>
    %3 = vector.shape_cast %2 : vector<1x3x256xf32> to vector<3x256xf32>
    %c0_4 = arith.constant 0 : index
    %c128 = arith.constant 128 : index
    %4 = vector.load %arg4[%c0_4, %c128] : memref<8x512xf32, #tpu.memory_space<vmem>>, vector<3x256xf32>
    tpu.vector_store %arg4[%c0_4, %c128], %3 {strides = array<i32>} : memref<8x512xf32, #tpu.memory_space<vmem>>, vector<3x256xf32>,
    %5 = tpu.iota {dimensions = array<i32: 1>} : vector<8x256xi32>
    %c15_i32 = arith.constant 15 : i32
    %6 = vector.broadcast %c15_i32 : i32 to vector<8x256xi32>
    %7 = arith.andi %5, %6 : vector<8x256xi32>
    %c1_i32 = arith.constant 1 : i32
    %8 = vector.broadcast %c1_i32 : i32 to vector<8x256xi32>
    %9 = arith.cmpi sge, %7, %8 : vector<8x256xi32>
    %c14_i32 = arith.constant 14 : i32
    %10 = vector.broadcast %c14_i32 : i32 to vector<8x256xi32>
    %11 = arith.cmpi sle, %7, %10 : vector<8x256xi32>
    %c0_5 = arith.constant 0 : index
    %c111 = arith.constant 111 : index
    %12 = vector.load %arg4[%c0_5, %c111] : memref<8x512xf32, #tpu.memory_space<vmem>>, vector<8x256xf32>
    %cst_6 = arith.constant 0.000000e+00 : f32
    %13 = vector.broadcast %cst_6 : f32 to vector<8x256xf32>
    %14 = arith.select %9, %12, %13 : vector<8x256xi1>, vector<8x256xf32>
    %c0_7 = arith.constant 0 : index
    %c0_8 = arith.constant 0 : index
    %15 = vector.load %arg5[%c0_7, %c0_8] : memref<80x256xf32, #tpu.memory_space<vmem>>, vector<8x256xf32>
    tpu.vector_store %arg5[%c0_7, %c0_8], %14 {strides = array<i32>} : memref<80x256xf32, #tpu.memory_space<vmem>>, vector<8x256xf32>,
    %c0_9 = arith.constant 0 : index
    %c112 = arith.constant 112 : index
    %16 = vector.load %arg4[%c0_9, %c112] : memref<8x512xf32, #tpu.memory_space<vmem>>, vector<8x256xf32>
    %c8 = arith.constant 8 : index
    %c0_10 = arith.constant 0 : index
    %17 = vector.load %arg5[%c8, %c0_10] : memref<80x256xf32, #tpu.memory_space<vmem>>, vector<8x256xf32>
    tpu.vector_store %arg5[%c8, %c0_10], %16 {strides = array<i32>} : memref<80x256xf32, #tpu.memory_space<vmem>>, vector<8x256xf32>,
    %c0_11 = arith.constant 0 : index
    %c113 = arith.constant 113 : index
    %18 = vector.load %arg4[%c0_11, %c113] : memref<8x512xf32, #tpu.memory_space<vmem>>, vector<8x256xf32>
    %cst_12 = arith.constant 0.000000e+00 : f32
    %19 = vector.broadcast %cst_12 : f32 to vector<8x256xf32>
    %20 = arith.select %11, %18, %19 : vector<8x256xi1>, vector<8x256xf32>
    %c16 = arith.constant 16 : index
    %c0_13 = arith.constant 0 : index
    %21 = vector.load %arg5[%c16, %c0_13] : memref<80x256xf32, #tpu.memory_space<vmem>>, vector<8x256xf32>
    tpu.vector_store %arg5[%c16, %c0_13], %20 {strides = array<i32>} : memref<80x256xf32, #tpu.memory_space<vmem>>, vector<8x256xf32>,
    %c0_14 = arith.constant 0 : index
    %c127 = arith.constant 127 : index
    %22 = vector.load %arg4[%c0_14, %c127] : memref<8x512xf32, #tpu.memory_space<vmem>>, vector<8x256xf32>
    %cst_15 = arith.constant 0.000000e+00 : f32
    %23 = vector.broadcast %cst_15 : f32 to vector<8x256xf32>
    %24 = arith.select %9, %22, %23 : vector<8x256xi1>, vector<8x256xf32>
    %c24 = arith.constant 24 : index
    %c0_16 = arith.constant 0 : index
    %25 = vector.load %arg5[%c24, %c0_16] : memref<80x256xf32, #tpu.memory_space<vmem>>, vector<8x256xf32>
    tpu.vector_store %arg5[%c24, %c0_16], %24 {strides = array<i32>} : memref<80x256xf32, #tpu.memory_space<vmem>>, vector<8x256xf32>,
    %c0_17 = arith.constant 0 : index
    %c128_18 = arith.constant 128 : index
    %26 = vector.load %arg4[%c0_17, %c128_18] : memref<8x512xf32, #tpu.memory_space<vmem>>, vector<8x256xf32>
    %c32 = arith.constant 32 : index
    %c0_19 = arith.constant 0 : index
    %27 = vector.load %arg5[%c32, %c0_19] : memref<80x256xf32, #tpu.memory_space<vmem>>, vector<8x256xf32>
    tpu.vector_store %arg5[%c32, %c0_19], %26 {strides = array<i32>} : memref<80x256xf32, #tpu.memory_space<vmem>>, vector<8x256xf32>,
    %c0_20 = arith.constant 0 : index
    %c129 = arith.constant 129 : index
    %28 = vector.load %arg4[%c0_20, %c129] : memref<8x512xf32, #tpu.memory_space<vmem>>, vector<8x256xf32>
    %cst_21 = arith.constant 0.000000e+00 : f32
    %29 = vector.broadcast %cst_21 : f32 to vector<8x256xf32>
    %30 = arith.select %11, %28, %29 : vector<8x256xi1>, vector<8x256xf32>
    %c40 = arith.constant 40 : index
    %c0_22 = arith.constant 0 : index
    %31 = vector.load %arg5[%c40, %c0_22] : memref<80x256xf32, #tpu.memory_space<vmem>>, vector<8x256xf32>
    tpu.vector_store %arg5[%c40, %c0_22], %30 {strides = array<i32>} : memref<80x256xf32, #tpu.memory_space<vmem>>, vector<8x256xf32>,
    %c0_23 = arith.constant 0 : index
    %c143 = arith.constant 143 : index
    %32 = vector.load %arg4[%c0_23, %c143] : memref<8x512xf32, #tpu.memory_space<vmem>>, vector<8x256xf32>
    %cst_24 = arith.constant 0.000000e+00 : f32
    %33 = vector.broadcast %cst_24 : f32 to vector<8x256xf32>
    %34 = arith.select %9, %32, %33 : vector<8x256xi1>, vector<8x256xf32>
    %c48 = arith.constant 48 : index
    %c0_25 = arith.constant 0 : index
    %35 = vector.load %arg5[%c48, %c0_25] : memref<80x256xf32, #tpu.memory_space<vmem>>, vector<8x256xf32>
    tpu.vector_store %arg5[%c48, %c0_25], %34 {strides = array<i32>} : memref<80x256xf32, #tpu.memory_space<vmem>>, vector<8x256xf32>,
    %c0_26 = arith.constant 0 : index
    %c144 = arith.constant 144 : index
    %36 = vector.load %arg4[%c0_26, %c144] : memref<8x512xf32, #tpu.memory_space<vmem>>, vector<8x256xf32>
    %c56 = arith.constant 56 : index
    %c0_27 = arith.constant 0 : index
    %37 = vector.load %arg5[%c56, %c0_27] : memref<80x256xf32, #tpu.memory_space<vmem>>, vector<8x256xf32>
    tpu.vector_store %arg5[%c56, %c0_27], %36 {strides = array<i32>} : memref<80x256xf32, #tpu.memory_space<vmem>>, vector<8x256xf32>,
    %c0_28 = arith.constant 0 : index
    %c145 = arith.constant 145 : index
    %38 = vector.load %arg4[%c0_28, %c145] : memref<8x512xf32, #tpu.memory_space<vmem>>, vector<8x256xf32>
    %cst_29 = arith.constant 0.000000e+00 : f32
    %39 = vector.broadcast %cst_29 : f32 to vector<8x256xf32>
    %40 = arith.select %11, %38, %39 : vector<8x256xi1>, vector<8x256xf32>
    %c64 = arith.constant 64 : index
    %c0_30 = arith.constant 0 : index
    %41 = vector.load %arg5[%c64, %c0_30] : memref<80x256xf32, #tpu.memory_space<vmem>>, vector<8x256xf32>
    tpu.vector_store %arg5[%c64, %c0_30], %40 {strides = array<i32>} : memref<80x256xf32, #tpu.memory_space<vmem>>, vector<8x256xf32>,
    %42 = tpu.iota {dimensions = array<i32: 0>} : vector<8x256xi32>
    %c0_i32 = arith.constant 0 : i32
    %43 = vector.broadcast %c0_i32 : i32 to vector<8x256xi32>
    %44 = arith.cmpi eq, %42, %43 : vector<8x256xi32>
    %45 = arith.extui %44 : vector<8x256xi1> to vector<8x256xi32>
    %46 = arith.sitofp %45 : vector<8x256xi32> to vector<8x256xf32>
    %c72 = arith.constant 72 : index
    %c0_31 = arith.constant 0 : index
    %47 = vector.load %arg5[%c72, %c0_31] : memref<80x256xf32, #tpu.memory_space<vmem>>, vector<8x256xf32>
    tpu.vector_store %arg5[%c72, %c0_31], %46 {strides = array<i32>} : memref<80x256xf32, #tpu.memory_space<vmem>>, vector<8x256xf32>,
    %c0_32 = arith.constant 0 : index
    %c0_33 = arith.constant 0 : index
    %48 = vector.load %arg2[%c0_32, %c0_33] : memref<16x80xf32, #tpu.memory_space<vmem>>, vector<16x80xf32>
    %c0_34 = arith.constant 0 : index
    %c0_35 = arith.constant 0 : index
    %49 = vector.load %arg5[%c0_34, %c0_35] : memref<80x256xf32, #tpu.memory_space<vmem>>, vector<80x256xf32>
    %cst_36 = arith.constant dense<0.000000e+00> : vector<16x256xf32>
    %50 = tpu.matmul %48, %49, %cst_36 {dimension_numbers = #tpu.dot_dimension_numbers<[1], [0], [0], [1], [0, 0, 1, 1], [], []>} : vector<16x80xf32>, vector<80x256xf32>, vector<16x256xf32> -> vector<16x256xf32>
    %cst_37 = arith.constant 0.000000e+00 : f32
    %51 = vector.broadcast %cst_37 : f32 to vector<16x256xf32>
    %52 = arith.maximumf %50, %51 : vector<16x256xf32>
    %c0_38 = arith.constant 0 : index
    %c0_39 = arith.constant 0 : index
    %c0_40 = arith.constant 0 : index
    %53 = vector.load %arg3[%c0_38, %c0_39, %c0_40] : memref<1x16x256xf32, #tpu.memory_space<vmem>>, vector<1x16x256xf32>
    %54 = vector.shape_cast %53 : vector<1x16x256xf32> to vector<16x256xf32>
    %55 = vector.shape_cast %52 : vector<16x256xf32> to vector<1x16x256xf32>
    tpu.vector_store %arg3[%c0_38, %c0_39, %c0_40], %55 {strides = array<i32>} : memref<1x16x256xf32, #tpu.memory_space<vmem>>, vector<1x16x256xf32>,
    return
  }
  func.func @transform_0(%arg0: i32) -> (i32, i32, i32) {
    %c0_i32 = arith.constant 0 : i32
    %c0_i32_0 = arith.constant 0 : i32
    %c0_i32_1 = arith.constant 0 : i32
    return %arg0, %c0_i32, %c0_i32_0 : i32, i32, i32
  }
  func.func @transform_1(%arg0: i32) -> (i32, i32) {
    %c0_i32 = arith.constant 0 : i32
    %c0_i32_0 = arith.constant 0 : i32
    %c0_i32_1 = arith.constant 0 : i32
    return %c0_i32, %c0_i32_0 : i32, i32
  }
  func.func @transform_2(%arg0: i32) -> (i32, i32, i32) {
    %c0_i32 = arith.constant 0 : i32
    %c0_i32_0 = arith.constant 0 : i32
    %c0_i32_1 = arith.constant 0 : i32
    return %arg0, %c0_i32, %c0_i32_0 : i32, i32, i32
  }
}

</mosaic_0001>

<bundles_post_ra>
// kernel: tpu_custom_call.1
= control target key start
LH: loop header
LB: loop body
LE: loop exit
PB: predicated region body
PF: predicated region fallthrough
CT: control target
= control target key end

     0   :  { %7 = vsyncpa [#allocation5], 0  ;;  %s889_s0 = inlined_call_operand.vmem [shape: f32[2,3,256], index: 0, kind: input, shape index: {}]   ;;  %s890_s1 = inlined_call_operand.vmem [shape: f32[16,80], index: 1, kind: input, shape index: {}]   ;;  %s891_s2 = inlined_call_operand.hbm [shape: f32[2,16,256], index: 2, kind: output, shape index: {}]  }
   0x1   :  { %9 = vsyncpa [#allocation5 + $0x1], 0  ;;  %s703_s9 = smov 0   ;;  %s705_s10 = smov 0  }
   0x2   :  { %s707_s11 = smov 0   ;;  %s709_s12 = smov 0  }
   0x3 LB: > { %s724_s13 = sadd.s32 4294967295, %s675_s12   ;;  %s500_s14 = sadd.s32 4294967294, %s675_s12   ;;  %s675_s12 = sphi %s709_s12, %s905_s12   ;;  %s671_s11 = sphi %s707_s11, %s904_s11   ;;  %s667_s10 = sphi %s705_s10, %s903_s10   ;;  %s663_s9 = sphi %s703_s9, %s902_s9  }
   0x4   : > { %s728_s15 = sadd.s32 1, %s675_s12   ;;  %s69_s16 = sadd.s32 1, %s671_s11 }
   0x5   : > { %s66_s17 = ssub.s32 %s675_s12, %s728_s15  ;;  %p79_p0 = scmp.ne.s32.totalorder %s671_s11, %s667_s10 }
   0x6   : > { %p67_p1 = scmp.eq.s32.totalorder %s66_s17, 0  ;;  %p80_p2 = scmp.eq.s32.totalorder %s724_s13, 1 }
   0x7   : > { %p85_p3 = scmp.ne.s32.totalorder %s667_s10, %s663_s9  ;;  %p86_p4 = scmp.eq.s32.totalorder %s500_s14, 1 }
   0x8   : > { %s739_s18 = scalar_select %p67_p1, %s671_s11, %s69_s16  }
   0x9   : > { %p741_p5 = por %p80_p2, %p79_p0  ;;  %p745_p6 = por %p86_p4, %p85_p3 }
   0xa   : > { %p503_p7 = scmp.ge.s32.totalorder %s675_s12, 1  ;;  %p115_p8 = scmp.lt.s32.totalorder %s675_s12, 3 }
   0xc   : > { %p116_p9 = pnand %p503_p7, %p115_p8 }
   0xd   : > { %s678_s21 = smov (!%p116_p9), 111   ;;  %p137_p10 = scmp.lt.s32.totalorder (!%p116_p9), %s724_s13, 1 }
   0xe   : > { %119 = sbr.rel (%p116_p9) target bundleno = 351 (0x15f), region = 28  ;;  %s679_s22 = smov (!%p116_p9), 112  }
   0xf   : > { %s680_s28 = smov (!%p116_p9), 113   ;;  %s681_s29 = smov (!%p116_p9), 127  }
  0x10   : > { %s682_s30 = smov (!%p116_p9), 1   ;;  %s683_s3 = smov (!%p116_p9), 15  }
  0x11   : > { %s684_s4 = smov (!%p116_p9), 16   ;;  %s685_s5 = smov (!%p116_p9), 17  }
  0x12   : > { %s134_s16 = sand.u32 (!%p116_p9), 1, %s667_s10  }
  0x13   : > { %v677_v0 = vmov 0.0   ;;  %s138_s23 = scalar_select %p137_p10, %s724_s13, 1  ;;  %v155_v8 = vlaneseq  ;;  %v686_v10 = vmov 1.0   ;;  %vm323_vm1 = vcmask 908288   ;;  %v340_v57 = vld [vmem:[%s890_s1 + $0x8] sm:$0xff]  ;;  %v339_v58 = vld [vmem:[%s890_s1] sm:$0xff] }
  0x14   : > { %321 = vrot.lane.b32.xlu1 %v677_v0, %s678_s21  ;;  %302 = vrot.lane.b32.xlu2 %v677_v0, %s679_s22  ;;  %143 = vst [vmem:[#allocation2] sm:$0xff] %v677_v0  ;;  %vm304_vm4 = vcmask 916480   ;;  %vm283_vm5 = vcmask 924672   ;;  %vm262_vm8 = vcmask 1039360   ;;  %vm237_vm9 = vcmask 7168   ;;  %s504_s17 = sshll.u32 %s134_s16, 5 }
  0x15   : > { %144 = vst [vmem:[#allocation2 + $0x18] sm:$0xff] %v677_v0  ;;  %s517_s24 = sshll.u32 %s138_s23, 3  ;;  %v333_v9 = vshrl.u32 %v155_v8, 7  ;;  %v156_v15 = vand.u32 127, %v155_v8  ;;  %vm216_vm10 = vcmask 121856   ;;  %vm197_vm11 = vcmask 130048  }
  0x16   : > { %s141_s27 = scalar_lea.vmem %s889_s0, %s517_s24  ;;  %vm176_vm12 = vcmask 138240   ;;  %vm361_vm13 = vcmask 654336  }
  0x17   : > { %v146_v1 = vld [vmem:[%s141_s27] sm:$0x77]  ;;  %vm334_vm0 = vcmp.eq.s32.totalorder %v333_v9, 0  ;;  %v157_v17 = vadd.s32 128, %v156_v15  ;;  %v158_v19 = vand.u32 15, %v156_v15 }
  0x18   : > { %148 = vst [vmem:[#allocation1] ss:$2 sm:$0xff] %v146_v1  ;;  %519 = vmatpush.msk.msra.mxu0 %vm334_vm0, %v686_v10  ;;  %533 = vmatpush.msk.msra.mxu2 %vm334_vm0, %v686_v10 }
  0x19   : > { %526 = vmatpush.msk.msra.mxu1 %vm334_vm0, %v686_v10  ;;  %543 = vmatpush.msk.msra.mxu3 %vm334_vm0, %v686_v10  ;;  %v159_v21 = vand.u32 15, %v157_v17  ;;  %vm778_vm2 = vcmp.le.s32.totalorder %v158_v19, 14  ;;  %vm794_vm6 = vcmp.ge.s32.totalorder %v158_v19, 1 }
  0x1b   : > { %vm782_vm3 = vcmp.le.s32.totalorder %v159_v21, 14  ;;  %vm798_vm7 = vcmp.ge.s32.totalorder %v159_v21, 1 }
  0x1c   : > { %281 = vrot.lane.b32.xlu1 %v677_v0, %s680_s28 }
  0x1f   : > { %v149_v2 = vld.sshfl [vmem:[#allocation1] sm:$0xff pattern:$0x75316420]  ;;  %v150_v3 = vld.sshfl [vmem:[#allocation1 + $0x8] sm:$0xff pattern:$0x75316420] }
  0x20   : > { %153 = vst [vmem:[#allocation2] sm:$0x7] %v149_v2 }
  0x21   : > { %154 = vst [vmem:[#allocation2 + $0x18] sm:$0x7] %v150_v3 }
  0x27   : > { %v756_v4 = vld [vmem:[#allocation2] sm:$0xff] }
  0x28   : > { %317 = vrot.lane.b32.xlu0 %v756_v4, %s678_s21  ;;  %v759_v5 = vld [vmem:[#allocation2 + $0x18] sm:$0xff]  ;;  %277 = vrot.lane.b32.xlu2 %v756_v4, %s680_s28  ;;  %v608_v7 = vpack.i.bf16 %v756_v4, %v677_v0 }
  0x29   : > { %v603_v6 = vpack.i.bf16 %v759_v5, %v756_v4 }
  0x2b   : > { %604 = vrot.lane.b32.xlu1 %v603_v6, %s679_s22  ;;  %s518_s22 = sshll.u32 %s724_s13, 5 }
  0x2c   : > { %s434_s25 = scalar_lea.hbm %s891_s2, %s518_s22 }
  0x2d   : > { %s437_s27 = sshll.u32 %s434_s25, 4  ;;  %s438_s27 = int_to_ptr.hbm [resolvable:$true] %s437_s27 }
  0x30   : > { %319 = vrot.lane.b32.xlu0 %v759_v5, %s678_s21  ;;  %256 = vrot.lane.b32.xlu2 %v756_v4, %s681_s29  ;;  %s136_s21 = scalar_lea.vmem [#allocation4], %s504_s17 }
  0x31   : > { %s435_s26 = sshll.u32 %s136_s21, 4  ;;  %s436_s26 = int_to_ptr.vmem [resolvable:$true] %s435_s26 }
  0x33   : > { %260 = vrot.lane.b32.xlu1 %v677_v0, %s681_s29 }
  0x38   : > { %279 = vrot.lane.b32.xlu0 %v759_v5, %s680_s28  ;;  %231 = vrot.lane.b32.xlu2 %v677_v0, %s682_s30  ;;  %s423_s28 = scalar_lea.sflag [#allocation5], %s134_s16 }
  0x3b   : > { %235 = vrot.lane.b32.xlu1 %v759_v5, %s682_s30 }
  0x40   : > { %258 = vrot.lane.b32.xlu0 %v759_v5, %s681_s29  ;;  %210 = vrot.lane.b32.xlu2 %v677_v0, %s683_s3  ;;  %s627_s29 = sshra.s32 %s438_s27, 4  ;;  %s628_s29 = int_to_ptr.hbm [resolvable:$true] %s627_s29 }
  0x41   : > { %p634_p0 = scmp.lt.s32.totalorder %s628_s29, %s891_s2 }
  0x43   : > { %214 = vrot.lane.b32.xlu1 %v759_v5, %s683_s3 }
  0x48   : > { %233 = vrot.lane.b32.xlu0 %v756_v4, %s682_s30  ;;  %609 = vrot.lane.b32.xlu2 %v608_v7, %s684_s4  ;;  %s629_s30 = scalar_lea.hbm %s628_s29, 32 }
  0x49   : > { %p630_p11 = scmp.ne.s32.totalorder %s628_s29, %s629_s30 }
  0x4b   : > { %170 = vrot.lane.b32.xlu1 %v677_v0, %s685_s5  ;;  %p631_p12 = pnand %p630_p11, %p741_p5 }
  0x4d   : > { %p632_p13 = pneg %p631_p12 }
  0x50   : > { %212 = vrot.lane.b32.xlu0 %v756_v4, %s683_s3  ;;  %172 = vrot.lane.b32.xlu2 %v756_v4, %s685_s5 }
  0x58   : > { %195 = vrot.lane.b32.xlu0 %v759_v5, %s684_s4 }
  0x60   : > { %174 = vrot.lane.b32.xlu0 %v759_v5, %s685_s5  ;;  %s633_s5 = scalar_lea.hbm %s891_s2, 64 }
  0x61   : > { %p635_p1 = scmp.lt.s32.totalorder %s633_s5, %s629_s30 }
  0x63   : > { %p636_p2 = por %p635_p1, %p634_p0 }
  0x65   : > { %p637_p3 = pnand %p636_p2, %p632_p13 }
  0x6e   : > { %v303_v11 = vpop.permute.xlu2 %302 }
  0x82   : > { %v278_v13 = vpop.permute.xlu2 %277 }
  0x86   : > { %v322_v12 = vpop.permute.xlu1 %321 }
  0x8a   : > { %v257_v18 = vpop.permute.xlu2 %256 }
  0x8e   : > { %v282_v14 = vpop.permute.xlu1 %281 }
  0x92   : > { %v232_v30 = vpop.permute.xlu2 %231 }
  0x9a   : > { %v318_v16 = vpop.permute.xlu0 %317  ;;  %v211_v38 = vpop.permute.xlu2 %210 }
  0x9d   : > { %v605_v20 = vpop.permute.xlu1 %604 }
  0x9e   : > { %v606_v22 = vunpack.i.l.bf16 %v605_v20  ;;  %v607_v23 = vunpack.i.h.bf16 %v605_v20 }
  0xa0   : > { %v305_v29 = vsel %vm304_vm4, %v606_v22, %v607_v23  ;;  %v306_v31 = vsel %vm304_vm4, %v607_v23, %v303_v11 }
  0xa2   : > { %v320_v25 = vpop.permute.xlu0 %319  ;;  %v610_v43 = vpop.permute.xlu2 %609 }
  0xa3   : > { %v324_v27 = vsel %vm323_vm1, %v318_v16, %v320_v25  ;;  %v325_v28 = vsel %vm323_vm1, %v320_v25, %v322_v12  ;;  %v611_v48 = vunpack.i.l.bf16 %v610_v43  ;;  %v612_v49 = vunpack.i.h.bf16 %v610_v43 }
  0xa4   : > { %520 = vmatpush.msk.msra.mxu0 %vm778_vm2, %v324_v27  ;;  %534 = vmatpush.msk.msra.mxu2 %vm778_vm2, %v324_v27 }
  0xa5   : > { %527 = vmatpush.msk.msra.mxu1 %vm782_vm3, %v325_v28  ;;  %544 = vmatpush.msk.msra.mxu3 %vm782_vm3, %v325_v28  ;;  %v261_v32 = vpop.permute.xlu1 %260  ;;  %v198_v55 = vsel %vm197_vm11, %v611_v48, %v612_v49 }
  0xa6   : > { %376 = vmatpush.msra.mxu0 %v305_v29  ;;  %535 = vmatpush.msra.mxu2 %v305_v29 }
  0xa7   : > { %399 = vmatpush.msra.mxu1 %v306_v31  ;;  %545 = vmatpush.msra.mxu3 %v306_v31 }
  0xaa   : > { %v280_v34 = vpop.permute.xlu0 %279  ;;  %v173_v50 = vpop.permute.xlu2 %172 }
  0xab   : > { %v284_v36 = vsel %vm283_vm5, %v278_v13, %v280_v34  ;;  %v285_v37 = vsel %vm283_vm5, %v280_v34, %v282_v14 }
  0xac   : > { %521 = vmatpush.msk.msra.mxu0 %vm794_vm6, %v284_v36  ;;  %536 = vmatpush.msk.msra.mxu2 %vm794_vm6, %v284_v36 }
  0xad   : > { %528 = vmatpush.msk.msra.mxu1 %vm798_vm7, %v285_v37  ;;  %546 = vmatpush.msk.msra.mxu3 %vm798_vm7, %v285_v37  ;;  %v236_v39 = vpop.permute.xlu1 %235 }
  0xb2   : > { %v259_v40 = vpop.permute.xlu0 %258 }
  0xb3   : > { %v263_v41 = vsel %vm262_vm8, %v257_v18, %v259_v40  ;;  %v264_v42 = vsel %vm262_vm8, %v259_v40, %v261_v32 }
  0xb4   : > { %522 = vmatpush.msk.msra.mxu0 %vm778_vm2, %v263_v41  ;;  %537 = vmatpush.msk.msra.mxu2 %vm778_vm2, %v263_v41 }
  0xb5   : > { %529 = vmatpush.msk.msra.mxu1 %vm782_vm3, %v264_v42  ;;  %547 = vmatpush.msk.msra.mxu3 %vm782_vm3, %v264_v42  ;;  %v215_v45 = vpop.permute.xlu1 %214 }
  0xb6   : > { %379 = vmatpush.msra.mxu0 %v756_v4  ;;  %538 = vmatpush.msra.mxu2 %v756_v4 }
  0xb7   : > { %402 = vmatpush.msra.mxu1 %v759_v5  ;;  %548 = vmatpush.msra.mxu3 %v759_v5 }
  0xba   : > { %v234_v44 = vpop.permute.xlu0 %233 }
  0xbb   : > { %v238_v46 = vsel %vm237_vm9, %v232_v30, %v234_v44  ;;  %v239_v47 = vsel %vm237_vm9, %v234_v44, %v236_v39 }
  0xbc   : > { %523 = vmatpush.msk.msra.mxu0 %vm794_vm6, %v238_v46  ;;  %539 = vmatpush.msk.msra.mxu2 %vm794_vm6, %v238_v46 }
  0xbd   : > { %530 = vmatpush.msk.msra.mxu1 %vm798_vm7, %v239_v47  ;;  %549 = vmatpush.msk.msra.mxu3 %vm798_vm7, %v239_v47  ;;  %v171_v52 = vpop.permute.xlu1 %170 }
  0xbe   : > { %v177_v56 = vsel %vm176_vm12, %v171_v52, %v173_v50 }
  0xc2   : > { %v213_v51 = vpop.permute.xlu0 %212 }
  0xc3   : > { %v217_v53 = vsel %vm216_vm10, %v211_v38, %v213_v51  ;;  %v218_v54 = vsel %vm216_vm10, %v213_v51, %v215_v45 }
  0xc4   : > { %524 = vmatpush.msk.msra.mxu0 %vm778_vm2, %v217_v53  ;;  %540 = vmatpush.msk.msra.mxu2 %vm778_vm2, %v217_v53 }
  0xc5   : > { %531 = vmatpush.msk.msra.mxu1 %vm782_vm3, %v218_v54  ;;  %550 = vmatpush.msk.msra.mxu3 %vm782_vm3, %v218_v54 }
  0xc6   : > { %382 = vmatpush.msra.mxu0 %v198_v55  ;;  %541 = vmatpush.msra.mxu2 %v198_v55 }
  0xc8   : > { %525 = vmatpush.msk.msra.mxu0 %vm794_vm6, %v177_v56  ;;  %542 = vmatpush.msk.msra.mxu2 %vm794_vm6, %v177_v56 }
  0xc9   : > { %509 = vmatmul.msk.f32.vlgmr.msra.gmra.mxu2 %vm361_vm13, %v340_v57  ;;  %508 = vmatmul.msk.f32.vlgmr.msra.gmra.mxu0 %vm361_vm13, %v339_v58 }
  0xca   : > { %v196_v59 = vpop.permute.xlu0 %195 }
  0xcb   : > { %v199_v60 = vsel %vm197_vm11, %v612_v49, %v196_v59 }
  0xcc   : > { %405 = vmatpush.msra.mxu1 %v199_v60  ;;  %551 = vmatpush.msra.mxu3 %v199_v60 }
  0xd2   : > { %v175_v61 = vpop.permute.xlu0 %174 }
  0xd3   : > { %v178_v62 = vsel %vm176_vm12, %v173_v50, %v175_v61 }
  0xd4   : > { %532 = vmatpush.msk.msra.mxu1 %vm798_vm7, %v178_v62  ;;  %552 = vmatpush.msk.msra.mxu3 %vm798_vm7, %v178_v62 }
  0xd5   : > { %511 = vmatmul.msk.f32.vlgmr.msra.gmra.mxu3 %vm361_vm13, %v340_v57  ;;  %510 = vmatmul.msk.f32.vlgmr.msra.gmra.mxu1 %vm361_vm13, %v339_v58 }
 0x146   : > { %v385_v63 = vpop.f32.mrf.mxu0 }
 0x147   : > { %v414_v0 = vmax.f32 %v385_v63, 0.0 }
 0x149   : > { %418 = vst [vmem:[%s136_s21] sm:$0xff] %v414_v0 }
 0x14c   : > { %v388_v1 = vpop.f32.mrf.mxu2 }
 0x14d   : > { %v416_v2 = vmax.f32 %v388_v1, 0.0 }
 0x14f   : > { %420 = vst [vmem:[%s136_s21 + $0x10] sm:$0xff] %v416_v2 }
 0x152   : > { %v408_v3 = vpop.f32.mrf.mxu1 }
 0x153   : > { %v415_v4 = vmax.f32 %v408_v3, 0.0 }
 0x155   : > { %419 = vst [vmem:[%s136_s21 + $0x8] sm:$0xff] %v415_v4 }
 0x158   : > { %v411_v5 = vpop.f32.mrf.mxu3 }
 0x159   : > { %v417_v6 = vmax.f32 %v411_v5, 0.0 }
 0x15b   : > { %421 = vst [vmem:[%s136_s21 + $0x18] sm:$0xff] %v417_v6 }
 0x15c   : > { %640 = shalt.err (!%p637_p3)
}
 0x15d   : > { %s687_s8 = smov 256  }
 0x15e   : > { %553 = dma.vmem_to_hbm [thread:$0]  (%p741_p5), %s436_s26, 512, %s438_s27, %s423_s28, %s687_s8, %s687_s8, %s684_s4  }
 0x15f PF: > { %p559_p4 = scmp.ge.s32.totalorder %s675_s12, 2  ;;  %s452_s14 = sand.u32 1, %s663_s9  }
 0x160   : > { %s453_s16 = scalar_lea.sflag [#allocation5], %s452_s14 }
 0x161   : > { %p556_p7 = pnand %p559_p4, %p745_p6 }
 0x163   : > { %p557_p8 = pneg %p556_p7 }
 0x165   : > { %658 = dma.done.wait (%p557_p8), %s453_s16, 512  }
 0x166   : > { %660 = vsyncadd (%p557_p8), %s453_s16, 4294966784  ;;  %p12_p9 = scmp.ge.s32.totalorder %s728_s15, 4   ;;  %s902_s9 = smov %s667_s10 }
 0x167   : > { %s903_s10 = smov %s671_s11  ;;  %s904_s11 = smov %s739_s18 }
 0x168   : > { %s905_s12 = smov %s728_s15  ;;  %14 = sbr.rel (!%p12_p9) target bundleno = 3 (0x3), region = 63 }
 0x16d   :  { %459 = vsyncpa [#allocation5], 1 }
 0x16e   :  { %461 = vsyncpa [#allocation5 + $0x1], 1 }

</bundles_post_ra>
